<compile_context>
chip_gen: v7x
topology: tpu7x:2x2x1
jax: 0.10.0
libtpu: 0.0.40
codegen_flags: <defaults>
</compile_context>

<pallas_src>
import functools

import jax
import jax.numpy as jnp
import numpy as np
from jax.experimental import pallas as pl
from jax.experimental.pallas import tpu as pltpu

IN_FEATURES = 512
OUT_FEATURES = 1000          # nn.Linear(512, 1000)
PADDED_OUT = 1024            # lane-dense multiple of 128 (padded cols masked in-kernel)


def _round_up(x, m):
    return (x + m - 1) // m * m


# ----------------------------------------------------------------------------
# Fused kernel: o = softmax(relu(x @ W + b)) over the first `valid_n` columns.
# ----------------------------------------------------------------------------
def _outer_kernel(x_ref, w_ref, b_ref, o_ref, *, valid_n):
    # MXU matmul in bf16 with f32 accumulation.
    x = x_ref[...].astype(jnp.bfloat16)                               # (TM, K)
    y = jnp.dot(x, w_ref[...], preferred_element_type=jnp.float32)    # (TM, Np) f32
    # f32 epilogue: bias + ReLU.
    y = jnp.maximum(y + b_ref[...], 0.0)
    # Mask the lane-padding columns out of the softmax (large-negative, not -inf,
    # keeps everything finite regardless of row content).
    col = jax.lax.broadcasted_iota(jnp.int32, y.shape, dimension=1)
    y = jnp.where(col < valid_n, y, jnp.float32(-1e30))
    # Row softmax; the N axis is not tiled, so the full row lives in this block.
    m = jnp.max(y, axis=1, keepdims=True)
    e = jnp.exp(y - m)                                                 # EUP
    inv = 1.0 / jnp.sum(e, axis=1, keepdims=True)                      # (TM, 1) exact f32
    o_ref[...] = e * inv                                               # broadcast multiply


def outer_forward(x, params):
    """x: (batch, 512) f32 -> (batch, 1000) f32 softmax probabilities."""
    w = params["w"]                      # (512, 1024) bf16
    b = params["b"]                      # (1, 1024)   f32
    M = x.shape[0]

    # Tile the batch (sublane) axis; pad rows so the grid divides exactly.
    # Large tiles amortize the ~0.35 us per-grid-step overhead; VMEM at TM=512 is
    # well under the 32 MiB limit (x 1 MiB + W 1 MiB + out 2 MiB, double-buffered).
    TM = min(512, _round_up(M, 8))
    Mp = _round_up(M, TM)
    xp = x.astype(jnp.float32)
    if Mp != M:
        xp = jnp.pad(xp, ((0, Mp - M), (0, 0)))
    grid = (Mp // TM,)

    cost = pl.CostEstimate(
        flops=2 * Mp * IN_FEATURES * PADDED_OUT,
        transcendentals=Mp * PADDED_OUT,
        bytes_accessed=(xp.size * 4 + w.size * 2 + b.size * 4
                        + Mp * PADDED_OUT * 4),
    )

    out = pl.pallas_call(
        functools.partial(_outer_kernel, valid_n=OUT_FEATURES),
        out_shape=jax.ShapeDtypeStruct((Mp, PADDED_OUT), jnp.float32),
        grid_spec=pltpu.PrefetchScalarGridSpec(
            num_scalar_prefetch=0,
            grid=grid,
            in_specs=[
                pl.BlockSpec((TM, IN_FEATURES), lambda i: (i, 0)),          # x tile
                pl.BlockSpec((IN_FEATURES, PADDED_OUT), lambda i: (0, 0)),  # W (resident)
                pl.BlockSpec((1, PADDED_OUT), lambda i: (0, 0)),            # bias
            ],
            out_specs=pl.BlockSpec((TM, PADDED_OUT), lambda i: (i, 0)),
        ),
        compiler_params=pltpu.CompilerParams(
            dimension_semantics=("parallel",),    # M tiles shard across v7x's 2 TCs
            vmem_limit_bytes=32 * 1024 * 1024,    # safe on v5e / v6e / v7x
        ),
        cost_estimate=cost,
    )(xp, w, b)

    return out[:M, :OUT_FEATURES]


# ----------------------------------------------------------------------------
# Deterministic parameters (PyTorch nn.Linear default init: U(+-1/sqrt(fan_in)))
# ----------------------------------------------------------------------------
def init_params(key):
    k_w, k_b = jax.random.split(key)
    bound = 1.0 / np.sqrt(IN_FEATURES)
    w = jax.random.uniform(k_w, (IN_FEATURES, OUT_FEATURES), jnp.float32, -bound, bound)
    b = jax.random.uniform(k_b, (OUT_FEATURES,), jnp.float32, -bound, bound)
    # Zero-pad the output (lane) dim to 1024; padded cols are masked in-kernel.
    w_p = jnp.zeros((IN_FEATURES, PADDED_OUT), jnp.float32).at[:, :OUT_FEATURES].set(w)
    b_p = jnp.zeros((1, PADDED_OUT), jnp.float32).at[:, :OUT_FEATURES].set(b)
    return {
        "w": w_p.astype(jnp.bfloat16),   # bf16 weights: half the HBM bytes, MXU-native
        "b": b_p,
        "w_f32": w,                      # kept only for the in-script reference check
        "b_f32": b,
    }


def _reference(x, w, b):
    y = jnp.maximum(x @ w + b, 0.0)
    y = y - jnp.max(y, axis=1, keepdims=True)
    e = jnp.exp(y)
    return e / jnp.sum(e, axis=1, keepdims=True)


# ----------------------------------------------------------------------------
if __name__ == "__main__":
    key = jax.random.PRNGKey(0)
    k_x, k_p = jax.random.split(key)

    BATCH = 2
    x = jax.random.normal(k_x, (BATCH, IN_FEATURES), jnp.float32)   # (batch, 512)
    params = init_params(k_p)

    out = jax.block_until_ready(jax.jit(outer_forward)(x, params))

    assert out.shape == (BATCH, OUT_FEATURES), out.shape
    assert bool(jnp.all(jnp.isfinite(out)))
    # softmax rows sum to ~1
    assert bool(jnp.allclose(jnp.sum(out, axis=1), 1.0, atol=1e-4))
    # matches the plain-JAX f32 reference up to bf16-matmul tolerance
    ref = _reference(x, params["w_f32"], params["b_f32"])
    assert bool(jnp.allclose(out, ref, atol=1e-3))
    print("KERNEL_OK")
</pallas_src>

<mosaic_0001>
module attributes {stable_mosaic.version = 11 : i64} {
  func.func @_outer_kernel(%arg0: i32, %arg1: memref<8x512xf32, #tpu.memory_space<vmem>>, %arg2: memref<512x1024xbf16, #tpu.memory_space<vmem>>, %arg3: memref<1x1024xf32, #tpu.memory_space<vmem>>, %arg4: memref<8x1024xf32, #tpu.memory_space<vmem>>) attributes {dimension_semantics = [#tpu.dimension_semantics<parallel>], iteration_bounds = array<i64: 1>, scalar_prefetch = 0 : i64, scratch_operands = 0 : i64, tpu.core_type = #tpu.core_type<tc>, window_params = [{transform_indices = @transform_0, window_bounds = array<i64: 8, 512>}, {pipeline_mode = #tpu.pipeline_mode<synchronous>, transform_indices = @transform_1, window_bounds = array<i64: 512, 1024>}, {pipeline_mode = #tpu.pipeline_mode<synchronous>, transform_indices = @transform_2, window_bounds = array<i64: 1, 1024>}, {transform_indices = @transform_3, window_bounds = array<i64: 8, 1024>}]} {
    %c0 = arith.constant 0 : index
    %c0_0 = arith.constant 0 : index
    %0 = vector.load %arg1[%c0, %c0_0] : memref<8x512xf32, #tpu.memory_space<vmem>>, vector<8x512xf32>
    %1 = arith.truncf %0 : vector<8x512xf32> to vector<8x512xbf16>
    %c0_1 = arith.constant 0 : index
    %c0_2 = arith.constant 0 : index
    %2 = vector.load %arg2[%c0_1, %c0_2] : memref<512x1024xbf16, #tpu.memory_space<vmem>>, vector<512x1024xbf16>
    %cst = arith.constant dense<0.000000e+00> : vector<8x1024xf32>
    %3 = tpu.matmul %1, %2, %cst {dimension_numbers = #tpu.dot_dimension_numbers<[1], [0], [0], [1], [0, 0, 1, 1], [], []>} : vector<8x512xbf16>, vector<512x1024xbf16>, vector<8x1024xf32> -> vector<8x1024xf32>
    %c0_3 = arith.constant 0 : index
    %c0_4 = arith.constant 0 : index
    %4 = vector.load %arg3[%c0_3, %c0_4] : memref<1x1024xf32, #tpu.memory_space<vmem>>, vector<1x1024xf32>
    %5 = vector.broadcast %4 : vector<1x1024xf32> to vector<8x1024xf32>
    %6 = arith.addf %3, %5 : vector<8x1024xf32>
    %cst_5 = arith.constant 0.000000e+00 : f32
    %7 = vector.broadcast %cst_5 : f32 to vector<8x1024xf32>
    %8 = arith.maximumf %6, %7 : vector<8x1024xf32>
    %9 = tpu.iota {dimensions = array<i32: 1>} : vector<8x1024xi32>
    %c1000_i32 = arith.constant 1000 : i32
    %10 = vector.broadcast %c1000_i32 : i32 to vector<8x1024xi32>
    %11 = arith.cmpi slt, %9, %10 : vector<8x1024xi32>
    %cst_6 = arith.constant -1.000000e+30 : f32
    %12 = vector.broadcast %cst_6 : f32 to vector<8x1024xf32>
    %13 = arith.select %11, %8, %12 : vector<8x1024xi1>, vector<8x1024xf32>
    %cst_7 = arith.constant dense<0xFF800000> : vector<8xf32>
    %14 = vector.multi_reduction <maximumf>, %13, %cst_7 [1] : vector<8x1024xf32> to vector<8xf32>
    %15 = vector.shape_cast %14 : vector<8xf32> to vector<8x1xf32>
    %16 = vector.broadcast %15 : vector<8x1xf32> to vector<8x1024xf32>
    %17 = arith.subf %13, %16 : vector<8x1024xf32>
    %18 = math.exp %17 : vector<8x1024xf32>
    %cst_8 = arith.constant dense<0.000000e+00> : vector<8xf32>
    %19 = vector.multi_reduction <add>, %18, %cst_8 [1] : vector<8x1024xf32> to vector<8xf32>
    %20 = vector.shape_cast %19 : vector<8xf32> to vector<8x1xf32>
    %cst_9 = arith.constant 1.000000e+00 : f32
    %21 = vector.broadcast %cst_9 : f32 to vector<8x1xf32>
    %22 = arith.divf %21, %20 : vector<8x1xf32>
    %23 = vector.broadcast %22 : vector<8x1xf32> to vector<8x1024xf32>
    %24 = arith.mulf %18, %23 : vector<8x1024xf32>
    %c0_10 = arith.constant 0 : index
    %c0_11 = arith.constant 0 : index
    %25 = vector.load %arg4[%c0_10, %c0_11] : memref<8x1024xf32, #tpu.memory_space<vmem>>, vector<8x1024xf32>
    tpu.vector_store %arg4[%c0_10, %c0_11], %24 {strides = array<i32>} : memref<8x1024xf32, #tpu.memory_space<vmem>>, vector<8x1024xf32>,
    return
  }
  func.func @transform_0(%arg0: i32) -> (i32, i32) {
    %c0_i32 = arith.constant 0 : i32
    %c0_i32_0 = arith.constant 0 : i32
    return %arg0, %c0_i32 : i32, i32
  }
  func.func @transform_1(%arg0: i32) -> (i32, i32) {
    %c0_i32 = arith.constant 0 : i32
    %c0_i32_0 = arith.constant 0 : i32
    %c0_i32_1 = arith.constant 0 : i32
    return %c0_i32, %c0_i32_0 : i32, i32
  }
  func.func @transform_2(%arg0: i32) -> (i32, i32) {
    %c0_i32 = arith.constant 0 : i32
    %c0_i32_0 = arith.constant 0 : i32
    %c0_i32_1 = arith.constant 0 : i32
    return %c0_i32, %c0_i32_0 : i32, i32
  }
  func.func @transform_3(%arg0: i32) -> (i32, i32) {
    %c0_i32 = arith.constant 0 : i32
    %c0_i32_0 = arith.constant 0 : i32
    return %arg0, %c0_i32 : i32, i32
  }
}

</mosaic_0001>

<bundles_post_ra>
// kernel: outer_forward.1
= control target key start
LH: loop header
LB: loop body
LE: loop exit
PB: predicated region body
PF: predicated region fallthrough
CT: control target
= control target key end

     0   :  { %8 = vsyncpa [#allocation3], 0  ;;  %s2365_s12 = smov [#allocation2]   ;;  %s2463_s0 = inlined_call_operand.vmem [shape: f32[8,512], index: 0, kind: input, shape index: {}]   ;;  %s2464_s1 = inlined_call_operand.hbm [shape: bf16[512,1024], index: 1, kind: input, shape index: {}]   ;;  %s2465_s2 = inlined_call_operand.vmem [shape: f32[1,1024], index: 2, kind: input, shape index: {}]   ;;  %s2466_s3 = inlined_call_operand.vmem [shape: f32[8,1024], index: 3, kind: output, shape index: {}]  }
   0x1   :  { %s16_s13 = sshll.u32 %s2365_s12, 4  ;;  %s2341_s16 = scalar_lea.hbm %s2464_s1, 32768  ;;  %s17_s13 = int_to_ptr.vmem [resolvable:$true] %s16_s13 }
   0x2   :  { %p2342_p0 = scmp.ne.s32.totalorder %s2464_s1, %s2341_s16  ;;  %p2345_p1 = scmp.lt.u32.totalorder %s2341_s16, %s2464_s1 }
   0x4   :  { %p2347_p2 = pnand %p2345_p1, %p2342_p0 }
   0x6   :  { %2350 = shalt.err (!%p2347_p2)
}
   0x7   :  { %s2351_s21 = scalar_lea.vmem %s17_s13, 32768  ;;  %p2356_p4 = scmp.lt.s32.totalorder %s17_s13, %s17_s13 }
   0x8   :  { %p2352_p3 = scmp.ne.s32.totalorder %s17_s13, %s2351_s21  ;;  %p2357_p5 = scmp.lt.s32.totalorder %s2351_s21, %s2351_s21 }
   0xa   :  { %p2358_p6 = por %p2357_p5, %p2356_p4 }
   0xc   :  { %p2359_p7 = pnand %p2358_p6, %p2352_p3 }
   0xe   :  { %2362 = shalt.err (!%p2359_p7)
}
   0xf   :  { %s2366_s22 = smov 512   ;;  %s2367_s23 = smov 32  }
  0x10   :  { %22 = dma.hbm_to_vmem [thread:$0]  %s2464_s1, 32768, %s17_s13, [#allocation3], %s2366_s22, %s2366_s22, %s2367_s23  }
  0x11   :  { %2363 = dma.done.wait [#allocation3], 32768  }
  0x12   :  { %2364 = vsyncadd [#allocation3], 4294934528  ;;  %v36_v0 = vld [vmem:[#allocation2] sm:$0xff]  ;;  %v37_v2 = vld [vmem:[#allocation2 + $0x8] sm:$0xff] }
  0x13   :  { %v40_v1 = vld [vmem:[#allocation2 + $0x20] sm:$0xff]  ;;  %v41_v4 = vld [vmem:[#allocation2 + $0x28] sm:$0xff] }
  0x14   :  { %v2041_v3 = vcombine.high %v36_v0, %v40_v1  ;;  %v2040_v5 = vcombine.low %v36_v0, %v40_v1  ;;  %v44_v6 = vld [vmem:[#allocation2 + $0x40] sm:$0xff]  ;;  %v2043_v8 = vcombine.high %v37_v2, %v41_v4  ;;  %v2042_v9 = vcombine.low %v37_v2, %v41_v4  ;;  %v45_v11 = vld [vmem:[#allocation2 + $0x48] sm:$0xff] }
  0x15   :  { %v48_v7 = vld [vmem:[#allocation2 + $0x60] sm:$0xff]  ;;  %v49_v12 = vld [vmem:[#allocation2 + $0x68] sm:$0xff] }
  0x16   :  { %v2049_v10 = vcombine.high %v44_v6, %v48_v7  ;;  %v52_v13 = vld [vmem:[#allocation2 + $0x80] sm:$0xff]  ;;  %1614 = vmatprep.subr.bf16.mxu0 %v2041_v3  ;;  %v2051_v14 = vcombine.high %v45_v11, %v49_v12  ;;  %v53_v16 = vld [vmem:[#allocation2 + $0x88] sm:$0xff]  ;;  %1696 = vmatprep.subr.bf16.mxu1 %v2043_v8  ;;  %v2048_v18 = vcombine.low %v44_v6, %v48_v7 }
  0x17   :  { %v56_v15 = vld [vmem:[#allocation2 + $0xa0] sm:$0xff]  ;;  %v57_v17 = vld [vmem:[#allocation2 + $0xa8] sm:$0xff]  ;;  %1615 = vmatpush1.bf16.msra.mxu0 %v2040_v5  ;;  %1697 = vmatpush1.bf16.msra.mxu1 %v2042_v9  ;;  %v2050_v19 = vcombine.low %v45_v11, %v49_v12 }
  0x18   :  { %1616 = vmatprep.subr.bf16.mxu0 %v2049_v10  ;;  %v2057_v20 = vcombine.high %v52_v13, %v56_v15  ;;  %1698 = vmatprep.subr.bf16.mxu1 %v2051_v14  ;;  %v2059_v21 = vcombine.high %v53_v16, %v57_v17  ;;  %v60_v22 = vld [vmem:[#allocation2 + $0xc0] sm:$0xff]  ;;  %v61_v24 = vld [vmem:[#allocation2 + $0xc8] sm:$0xff]  ;;  %v2056_v26 = vcombine.low %v52_v13, %v56_v15 }
  0x19   :  { %v64_v23 = vld [vmem:[#allocation2 + $0xe0] sm:$0xff]  ;;  %v65_v25 = vld [vmem:[#allocation2 + $0xe8] sm:$0xff]  ;;  %v2058_v27 = vcombine.low %v53_v16, %v57_v17 }
  0x1a   :  { %v2065_v28 = vcombine.high %v60_v22, %v64_v23  ;;  %v2067_v29 = vcombine.high %v61_v24, %v65_v25  ;;  %v68_v30 = vld [vmem:[#allocation2 + $0x100] sm:$0xff]  ;;  %v69_v32 = vld [vmem:[#allocation2 + $0x108] sm:$0xff]  ;;  %v2064_v34 = vcombine.low %v60_v22, %v64_v23  ;;  %v2066_v35 = vcombine.low %v61_v24, %v65_v25 }
  0x1b   :  { %1617 = vmatpush1.bf16.msra.mxu0 %v2048_v18  ;;  %1699 = vmatpush1.bf16.msra.mxu1 %v2050_v19  ;;  %v72_v31 = vld [vmem:[#allocation2 + $0x120] sm:$0xff]  ;;  %v73_v33 = vld [vmem:[#allocation2 + $0x128] sm:$0xff] }
  0x1c   :  { %1618 = vmatprep.subr.bf16.mxu0 %v2057_v20  ;;  %1700 = vmatprep.subr.bf16.mxu1 %v2059_v21  ;;  %v2073_v36 = vcombine.high %v68_v30, %v72_v31  ;;  %v2075_v37 = vcombine.high %v69_v32, %v73_v33  ;;  %v76_v38 = vld [vmem:[#allocation2 + $0x140] sm:$0xff]  ;;  %v77_v40 = vld [vmem:[#allocation2 + $0x148] sm:$0xff]  ;;  %v2072_v42 = vcombine.low %v68_v30, %v72_v31 }
  0x1d   :  { %v80_v39 = vld [vmem:[#allocation2 + $0x160] sm:$0xff]  ;;  %v81_v41 = vld [vmem:[#allocation2 + $0x168] sm:$0xff]  ;;  %v2074_v43 = vcombine.low %v69_v32, %v73_v33 }
  0x1e   :  { %v2081_v44 = vcombine.high %v76_v38, %v80_v39  ;;  %v2083_v45 = vcombine.high %v77_v40, %v81_v41  ;;  %v84_v46 = vld [vmem:[#allocation2 + $0x180] sm:$0xff]  ;;  %v85_v48 = vld [vmem:[#allocation2 + $0x188] sm:$0xff]  ;;  %v2080_v50 = vcombine.low %v76_v38, %v80_v39  ;;  %v2082_v51 = vcombine.low %v77_v40, %v81_v41 }
  0x1f   :  { %1619 = vmatpush1.bf16.msra.mxu0 %v2056_v26  ;;  %1701 = vmatpush1.bf16.msra.mxu1 %v2058_v27  ;;  %v88_v47 = vld [vmem:[#allocation2 + $0x1a0] sm:$0xff]  ;;  %v89_v49 = vld [vmem:[#allocation2 + $0x1a8] sm:$0xff] }
  0x20   :  { %1620 = vmatprep.subr.bf16.mxu0 %v2065_v28  ;;  %1702 = vmatprep.subr.bf16.mxu1 %v2067_v29  ;;  %v2089_v52 = vcombine.high %v84_v46, %v88_v47  ;;  %v29_v53 = vld [vmem:[%s2463_s0 + $0x8] sm:$0xff]  ;;  %v2091_v54 = vcombine.high %v85_v48, %v89_v49  ;;  %v92_v55 = vld [vmem:[#allocation2 + $0x1c0] sm:$0xff]  ;;  %v2088_v60 = vcombine.low %v84_v46, %v88_v47 }
  0x21   :  { %v96_v56 = vld [vmem:[#allocation2 + $0x1e0] sm:$0xff]  ;;  %v2403_v57 = vpack.c.bf16 %v29_v53, %v29_v53  ;;  %v93_v58 = vld [vmem:[#allocation2 + $0x1c8] sm:$0xff]  ;;  %v2090_v61 = vcombine.low %v85_v48, %v89_v49 }
  0x22   :  { %v97_v59 = vld [vmem:[#allocation2 + $0x1e8] sm:$0xff]  ;;  %v2097_v62 = vcombine.high %v92_v55, %v96_v56  ;;  %v100_v0 = vld [vmem:[#allocation2 + $0x200] sm:$0xff]  ;;  %v2096_v4 = vcombine.low %v92_v55, %v96_v56 }
  0x23   :  { %1621 = vmatpush1.bf16.msra.mxu0 %v2064_v34  ;;  %1703 = vmatpush1.bf16.msra.mxu1 %v2066_v35  ;;  %v2099_v63 = vcombine.high %v93_v58, %v97_v59  ;;  %v104_v1 = vld [vmem:[#allocation2 + $0x220] sm:$0xff]  ;;  %v101_v2 = vld [vmem:[#allocation2 + $0x208] sm:$0xff]  ;;  %v2098_v5 = vcombine.low %v93_v58, %v97_v59 }
  0x24   :  { %1622 = vmatprep.subr.bf16.mxu0 %v2073_v36  ;;  %1704 = vmatprep.subr.bf16.mxu1 %v2075_v37  ;;  %v105_v3 = vld [vmem:[#allocation2 + $0x228] sm:$0xff]  ;;  %v2105_v6 = vcombine.high %v100_v0, %v104_v1  ;;  %v108_v8 = vld [vmem:[#allocation2 + $0x240] sm:$0xff]  ;;  %v2104_v12 = vcombine.low %v100_v0, %v104_v1 }
  0x25   :  { %1646 = vmatprep.mubr.bf16.mxu0 %v2403_v57  ;;  %1728 = vmatprep.mubr.bf16.mxu1 %v2403_v57  ;;  %v2107_v7 = vcombine.high %v101_v2, %v105_v3  ;;  %v112_v9 = vld [vmem:[#allocation2 + $0x260] sm:$0xff]  ;;  %v109_v10 = vld [vmem:[#allocation2 + $0x248] sm:$0xff]  ;;  %v2106_v13 = vcombine.low %v101_v2, %v105_v3 }
  0x26   :  { %v113_v11 = vld [vmem:[#allocation2 + $0x268] sm:$0xff]  ;;  %v2113_v14 = vcombine.high %v108_v8, %v112_v9  ;;  %v116_v16 = vld [vmem:[#allocation2 + $0x280] sm:$0xff]  ;;  %v2112_v20 = vcombine.low %v108_v8, %v112_v9 }
  0x27   :  { %1623 = vmatpush1.bf16.msra.mxu0 %v2072_v42  ;;  %1705 = vmatpush1.bf16.msra.mxu1 %v2074_v43  ;;  %v2115_v15 = vcombine.high %v109_v10, %v113_v11  ;;  %v120_v17 = vld [vmem:[#allocation2 + $0x2a0] sm:$0xff]  ;;  %v117_v18 = vld [vmem:[#allocation2 + $0x288] sm:$0xff]  ;;  %v2114_v21 = vcombine.low %v109_v10, %v113_v11 }
  0x28   :  { %1624 = vmatprep.subr.bf16.mxu0 %v2081_v44  ;;  %1706 = vmatprep.subr.bf16.mxu1 %v2083_v45  ;;  %v121_v19 = vld [vmem:[#allocation2 + $0x2a8] sm:$0xff]  ;;  %v2121_v22 = vcombine.high %v116_v16, %v120_v17  ;;  %v124_v24 = vld [vmem:[#allocation2 + $0x2c0] sm:$0xff]  ;;  %v2120_v28 = vcombine.low %v116_v16, %v120_v17 }
  0x29   :  { %v2123_v23 = vcombine.high %v117_v18, %v121_v19  ;;  %v128_v25 = vld [vmem:[#allocation2 + $0x2e0] sm:$0xff]  ;;  %v125_v26 = vld [vmem:[#allocation2 + $0x2c8] sm:$0xff]  ;;  %v2122_v29 = vcombine.low %v117_v18, %v121_v19 }
  0x2a   :  { %v129_v27 = vld [vmem:[#allocation2 + $0x2e8] sm:$0xff]  ;;  %v2129_v30 = vcombine.high %v124_v24, %v128_v25  ;;  %v132_v32 = vld [vmem:[#allocation2 + $0x300] sm:$0xff]  ;;  %v2128_v36 = vcombine.low %v124_v24, %v128_v25 }
  0x2b   :  { %1625 = vmatpush1.bf16.msra.mxu0 %v2080_v50  ;;  %1707 = vmatpush1.bf16.msra.mxu1 %v2082_v51  ;;  %v2131_v31 = vcombine.high %v125_v26, %v129_v27  ;;  %v136_v33 = vld [vmem:[#allocation2 + $0x320] sm:$0xff]  ;;  %v133_v34 = vld [vmem:[#allocation2 + $0x308] sm:$0xff]  ;;  %v2130_v37 = vcombine.low %v125_v26, %v129_v27 }
  0x2c   :  { %1626 = vmatprep.subr.bf16.mxu0 %v2089_v52  ;;  %1708 = vmatprep.subr.bf16.mxu1 %v2091_v54  ;;  %v137_v35 = vld [vmem:[#allocation2 + $0x328] sm:$0xff]  ;;  %v2137_v38 = vcombine.high %v132_v32, %v136_v33  ;;  %v140_v40 = vld [vmem:[#allocation2 + $0x340] sm:$0xff]  ;;  %v2136_v44 = vcombine.low %v132_v32, %v136_v33 }
  0x2d   :  { %v2139_v39 = vcombine.high %v133_v34, %v137_v35  ;;  %v144_v41 = vld [vmem:[#allocation2 + $0x360] sm:$0xff]  ;;  %v141_v42 = vld [vmem:[#allocation2 + $0x348] sm:$0xff]  ;;  %v2138_v45 = vcombine.low %v133_v34, %v137_v35 }
  0x2e   :  { %v145_v43 = vld [vmem:[#allocation2 + $0x368] sm:$0xff]  ;;  %v2145_v46 = vcombine.high %v140_v40, %v144_v41  ;;  %v148_v48 = vld [vmem:[#allocation2 + $0x380] sm:$0xff]  ;;  %v2144_v52 = vcombine.low %v140_v40, %v144_v41 }
  0x2f   :  { %1627 = vmatpush1.bf16.msra.mxu0 %v2088_v60  ;;  %1709 = vmatpush1.bf16.msra.mxu1 %v2090_v61  ;;  %v2147_v47 = vcombine.high %v141_v42, %v145_v43  ;;  %v152_v49 = vld [vmem:[#allocation2 + $0x3a0] sm:$0xff]  ;;  %v149_v50 = vld [vmem:[#allocation2 + $0x388] sm:$0xff]  ;;  %v2146_v53 = vcombine.low %v141_v42, %v145_v43 }
  0x30   :  { %1628 = vmatprep.subr.bf16.mxu0 %v2097_v62  ;;  %1710 = vmatprep.subr.bf16.mxu1 %v2099_v63  ;;  %v153_v51 = vld [vmem:[#allocation2 + $0x3a8] sm:$0xff]  ;;  %v2153_v54 = vcombine.high %v148_v48, %v152_v49  ;;  %v156_v56 = vld [vmem:[#allocation2 + $0x3c0] sm:$0xff]  ;;  %v2152_v61 = vcombine.low %v148_v48, %v152_v49 }
  0x31   :  { %v2155_v55 = vcombine.high %v149_v50, %v153_v51  ;;  %v160_v58 = vld [vmem:[#allocation2 + $0x3e0] sm:$0xff]  ;;  %v157_v59 = vld [vmem:[#allocation2 + $0x3c8] sm:$0xff]  ;;  %v2154_v62 = vcombine.low %v149_v50, %v153_v51 }
  0x32   :  { %v161_v60 = vld [vmem:[#allocation2 + $0x3e8] sm:$0xff]  ;;  %v2161_v63 = vcombine.high %v156_v56, %v160_v58  ;;  %v164_v1 = vld [vmem:[#allocation2 + $0x400] sm:$0xff] }
  0x33   :  { %1629 = vmatpush1.bf16.msra.mxu0 %v2096_v4  ;;  %1711 = vmatpush1.bf16.msra.mxu1 %v2098_v5  ;;  %v2163_v0 = vcombine.high %v157_v59, %v161_v60  ;;  %v168_v2 = vld [vmem:[#allocation2 + $0x420] sm:$0xff]  ;;  %v165_v3 = vld [vmem:[#allocation2 + $0x408] sm:$0xff]  ;;  %v2160_v5 = vcombine.low %v156_v56, %v160_v58 }
  0x34   :  { %1630 = vmatprep.subr.bf16.mxu0 %v2105_v6  ;;  %1712 = vmatprep.subr.bf16.mxu1 %v2107_v7  ;;  %v169_v4 = vld [vmem:[#allocation2 + $0x428] sm:$0xff]  ;;  %v28_v6 = vld [vmem:[%s2463_s0] sm:$0xff]  ;;  %v2162_v7 = vcombine.low %v157_v59, %v161_v60  ;;  %v2169_v8 = vcombine.high %v164_v1, %v168_v2  ;;  %v2168_v16 = vcombine.low %v164_v1, %v168_v2 }
  0x35   :  { %v2171_v9 = vcombine.high %v165_v3, %v169_v4  ;;  %v172_v10 = vld [vmem:[#allocation2 + $0x440] sm:$0xff]  ;;  %v2170_v17 = vcombine.low %v165_v3, %v169_v4  ;;  %v185_v24 = vld [vmem:[#allocation2 + $0x4a8] sm:$0xff] }
  0x36   :  { %v176_v11 = vld [vmem:[#allocation2 + $0x460] sm:$0xff]  ;;  %v193_v32 = vld [vmem:[#allocation2 + $0x4e8] sm:$0xff] }
  0x37   :  { %1631 = vmatpush1.bf16.msra.mxu0 %v2104_v12  ;;  %1713 = vmatpush1.bf16.msra.mxu1 %v2106_v13  ;;  %v2410_v12 = vpack.c.bf16 %v28_v6, %v28_v6  ;;  %v173_v13 = vld [vmem:[#allocation2 + $0x448] sm:$0xff]  ;;  %v2177_v18 = vcombine.high %v172_v10, %v176_v11  ;;  %v2176_v25 = vcombine.low %v172_v10, %v176_v11  ;;  %v228_v6 = vld [vmem:[#allocation2 + $0x600] sm:$0xff] }
  0x38   :  { %1632 = vmatprep.subr.bf16.mxu0 %v2113_v14  ;;  %1714 = vmatprep.subr.bf16.mxu1 %v2115_v15  ;;  %v177_v14 = vld [vmem:[#allocation2 + $0x468] sm:$0xff]  ;;  %v31_v15 = vld [vmem:[%s2463_s0 + $0x18] sm:$0xff] }
  0x39   :  { %v2179_v19 = vcombine.high %v173_v13, %v177_v14  ;;  %v2178_v26 = vcombine.low %v173_v13, %v177_v14  ;;  %v201_v40 = vld [vmem:[#allocation2 + $0x528] sm:$0xff] }
  0x3a   :  { %v209_v48 = vld [vmem:[#allocation2 + $0x568] sm:$0xff] }
  0x3b   :  { %1633 = vmatpush1.bf16.msra.mxu0 %v2112_v20  ;;  %1715 = vmatpush1.bf16.msra.mxu1 %v2114_v21  ;;  %v180_v20 = vld [vmem:[#allocation2 + $0x480] sm:$0xff]  ;;  %v217_v56 = vld [vmem:[#allocation2 + $0x5a8] sm:$0xff] }
  0x3c   :  { %1634 = vmatprep.subr.bf16.mxu0 %v2121_v22  ;;  %1716 = vmatprep.subr.bf16.mxu1 %v2123_v23  ;;  %v184_v21 = vld [vmem:[#allocation2 + $0x4a0] sm:$0xff]  ;;  %v2415_v22 = vpack.c.bf16 %v31_v15, %v31_v15  ;;  %v181_v23 = vld [vmem:[#allocation2 + $0x488] sm:$0xff] }
  0x3d   :  { %v2185_v27 = vcombine.high %v180_v20, %v184_v21  ;;  %v2184_v33 = vcombine.low %v180_v20, %v184_v21  ;;  %v2186_v34 = vcombine.low %v181_v23, %v185_v24  ;;  %v225_v1 = vld [vmem:[#allocation2 + $0x5e8] sm:$0xff]  ;;  %v236_v15 = vld [vmem:[#allocation2 + $0x640] sm:$0xff] }
  0x3f   :  { %1635 = vmatpush1.bf16.msra.mxu0 %v2120_v28  ;;  %1717 = vmatpush1.bf16.msra.mxu1 %v2122_v29  ;;  %v2187_v28 = vcombine.high %v181_v23, %v185_v24  ;;  %v188_v29 = vld [vmem:[#allocation2 + $0x4c0] sm:$0xff] }
  0x40   :  { %1636 = vmatprep.subr.bf16.mxu0 %v2129_v30  ;;  %1718 = vmatprep.subr.bf16.mxu1 %v2131_v31  ;;  %v192_v30 = vld [vmem:[#allocation2 + $0x4e0] sm:$0xff]  ;;  %v189_v31 = vld [vmem:[#allocation2 + $0x4c8] sm:$0xff] }
  0x41   :  { %v2193_v35 = vcombine.high %v188_v29, %v192_v30  ;;  %v2192_v41 = vcombine.low %v188_v29, %v192_v30  ;;  %v2194_v42 = vcombine.low %v189_v31, %v193_v32  ;;  %v244_v24 = vld [vmem:[#allocation2 + $0x680] sm:$0xff] }
  0x43   :  { %1637 = vmatpush1.bf16.msra.mxu0 %v2128_v36  ;;  %1719 = vmatpush1.bf16.msra.mxu1 %v2130_v37  ;;  %v2195_v36 = vcombine.high %v189_v31, %v193_v32  ;;  %v196_v37 = vld [vmem:[#allocation2 + $0x500] sm:$0xff] }
  0x44   :  { %1638 = vmatprep.subr.bf16.mxu0 %v2137_v38  ;;  %1720 = vmatprep.subr.bf16.mxu1 %v2139_v39  ;;  %v200_v38 = vld [vmem:[#allocation2 + $0x520] sm:$0xff]  ;;  %v197_v39 = vld [vmem:[#allocation2 + $0x508] sm:$0xff] }
  0x45   :  { %v2201_v43 = vcombine.high %v196_v37, %v200_v38  ;;  %v2200_v49 = vcombine.low %v196_v37, %v200_v38  ;;  %v2202_v50 = vcombine.low %v197_v39, %v201_v40  ;;  %v252_v32 = vld [vmem:[#allocation2 + $0x6c0] sm:$0xff] }
  0x47   :  { %1639 = vmatpush1.bf16.msra.mxu0 %v2136_v44  ;;  %1721 = vmatpush1.bf16.msra.mxu1 %v2138_v45  ;;  %v2203_v44 = vcombine.high %v197_v39, %v201_v40  ;;  %v204_v45 = vld [vmem:[#allocation2 + $0x540] sm:$0xff] }
  0x48   :  { %1640 = vmatprep.subr.bf16.mxu0 %v2145_v46  ;;  %1722 = vmatprep.subr.bf16.mxu1 %v2147_v47  ;;  %v208_v46 = vld [vmem:[#allocation2 + $0x560] sm:$0xff]  ;;  %v205_v47 = vld [vmem:[#allocation2 + $0x548] sm:$0xff] }
  0x49   :  { %v2209_v51 = vcombine.high %v204_v45, %v208_v46  ;;  %v2208_v58 = vcombine.low %v204_v45, %v208_v46  ;;  %v2210_v59 = vcombine.low %v205_v47, %v209_v48  ;;  %v260_v40 = vld [vmem:[#allocation2 + $0x700] sm:$0xff] }
  0x4b   :  { %1641 = vmatpush1.bf16.msra.mxu0 %v2144_v52  ;;  %1723 = vmatpush1.bf16.msra.mxu1 %v2146_v53  ;;  %v2211_v52 = vcombine.high %v205_v47, %v209_v48  ;;  %v212_v53 = vld [vmem:[#allocation2 + $0x580] sm:$0xff] }
  0x4c   :  { %1642 = vmatprep.subr.bf16.mxu0 %v2153_v54  ;;  %1724 = vmatprep.subr.bf16.mxu1 %v2155_v55  ;;  %v216_v54 = vld [vmem:[#allocation2 + $0x5a0] sm:$0xff]  ;;  %v213_v55 = vld [vmem:[#allocation2 + $0x588] sm:$0xff] }
  0x4d   :  { %v2217_v60 = vcombine.high %v212_v53, %v216_v54  ;;  %v2216_v2 = vcombine.low %v212_v53, %v216_v54  ;;  %v2218_v3 = vcombine.low %v213_v55, %v217_v56  ;;  %v268_v48 = vld [vmem:[#allocation2 + $0x740] sm:$0xff] }
  0x4f   :  { %1643 = vmatpush1.bf16.msra.mxu0 %v2152_v61  ;;  %1725 = vmatpush1.bf16.msra.mxu1 %v2154_v62  ;;  %v2219_v61 = vcombine.high %v213_v55, %v217_v56  ;;  %v220_v62 = vld [vmem:[#allocation2 + $0x5c0] sm:$0xff] }
  0x50   :  { %1644 = vmatprep.subr.bf16.mxu0 %v2161_v63  ;;  %1726 = vmatprep.subr.bf16.mxu1 %v2163_v0  ;;  %v224_v63 = vld [vmem:[#allocation2 + $0x5e0] sm:$0xff]  ;;  %v221_v0 = vld [vmem:[#allocation2 + $0x5c8] sm:$0xff] }
  0x51   :  { %v2225_v4 = vcombine.high %v220_v62, %v224_v63  ;;  %v2224_v10 = vcombine.low %v220_v62, %v224_v63  ;;  %v2226_v11 = vcombine.low %v221_v0, %v225_v1  ;;  %v276_v56 = vld [vmem:[#allocation2 + $0x780] sm:$0xff] }
  0x53   :  { %1645 = vmatpush1.bf16.msra.mxu0 %v2160_v5  ;;  %1727 = vmatpush1.bf16.msra.mxu1 %v2162_v7  ;;  %v2227_v5 = vcombine.high %v221_v0, %v225_v1  ;;  %v232_v7 = vld [vmem:[#allocation2 + $0x620] sm:$0xff] }
  0x54   :  { %1655 = vmatprep.subr.bf16.mxu0 %v2169_v8  ;;  %1737 = vmatprep.subr.bf16.mxu1 %v2171_v9  ;;  %v229_v8 = vld [vmem:[#allocation2 + $0x608] sm:$0xff]  ;;  %v2233_v13 = vcombine.high %v228_v6, %v232_v7  ;;  %v284_v1 = vld [vmem:[#allocation2 + $0x7c0] sm:$0xff] }
  0x55   :  { %v233_v9 = vld [vmem:[#allocation2 + $0x628] sm:$0xff] }
  0x56   :  { %1647 = vmatmul.mubr.bf16.vlgmr.msra.gmra.mrb[0].mxu0 %v2410_v12  ;;  %1729 = vmatmul.mubr.bf16.vlgmr.msra.gmra.mrb[0].mxu1 %v2410_v12  ;;  %v2235_v14 = vcombine.high %v229_v8, %v233_v9  ;;  %v2234_v20 = vcombine.low %v229_v8, %v233_v9  ;;  %v38_v9 = vld [vmem:[#allocation2 + $0x10] sm:$0xff] }
  0x57   :  { %1656 = vmatpush1.bf16.msra.mxu0 %v2168_v16  ;;  %1738 = vmatpush1.bf16.msra.mxu1 %v2170_v17  ;;  %v240_v16 = vld [vmem:[#allocation2 + $0x660] sm:$0xff]  ;;  %v237_v17 = vld [vmem:[#allocation2 + $0x648] sm:$0xff] }
  0x58   :  { %1657 = vmatprep.subr.bf16.mxu0 %v2177_v18  ;;  %1739 = vmatprep.subr.bf16.mxu1 %v2179_v19  ;;  %v241_v18 = vld [vmem:[#allocation2 + $0x668] sm:$0xff]  ;;  %v2232_v19 = vcombine.low %v228_v6, %v232_v7  ;;  %v2241_v21 = vcombine.high %v236_v15, %v240_v16 }
  0x59   :  { %1687 = vmatprep.mubr.bf16.mxu0 %v2415_v22  ;;  %1769 = vmatprep.mubr.bf16.mxu1 %v2415_v22  ;;  %v2243_v23 = vcombine.high %v237_v17, %v241_v18  ;;  %v2242_v29 = vcombine.low %v237_v17, %v241_v18 }
  0x5b   :  { %1658 = vmatpush1.bf16.msra.mxu0 %v2176_v25  ;;  %1740 = vmatpush1.bf16.msra.mxu1 %v2178_v26  ;;  %v248_v25 = vld [vmem:[#allocation2 + $0x6a0] sm:$0xff]  ;;  %v245_v26 = vld [vmem:[#allocation2 + $0x688] sm:$0xff] }
  0x5c   :  { %1659 = vmatprep.subr.bf16.mxu0 %v2185_v27  ;;  %1741 = vmatprep.subr.bf16.mxu1 %v2187_v28  ;;  %v249_v27 = vld [vmem:[#allocation2 + $0x6a8] sm:$0xff]  ;;  %v2240_v28 = vcombine.low %v236_v15, %v240_v16  ;;  %v2249_v30 = vcombine.high %v244_v24, %v248_v25  ;;  %v30_v15 = vld [vmem:[%s2463_s0 + $0x10] sm:$0xff] }
  0x5d   :  { %v2251_v31 = vcombine.high %v245_v26, %v249_v27  ;;  %v2250_v37 = vcombine.low %v245_v26, %v249_v27 }
  0x5f   :  { %1660 = vmatpush1.bf16.msra.mxu0 %v2184_v33  ;;  %1742 = vmatpush1.bf16.msra.mxu1 %v2186_v34  ;;  %v256_v33 = vld [vmem:[#allocation2 + $0x6e0] sm:$0xff]  ;;  %v253_v34 = vld [vmem:[#allocation2 + $0x6c8] sm:$0xff] }
  0x60   :  { %1661 = vmatprep.subr.bf16.mxu0 %v2193_v35  ;;  %1743 = vmatprep.subr.bf16.mxu1 %v2195_v36  ;;  %v257_v35 = vld [vmem:[#allocation2 + $0x6e8] sm:$0xff]  ;;  %v2248_v36 = vcombine.low %v244_v24, %v248_v25  ;;  %v2257_v38 = vcombine.high %v252_v32, %v256_v33  ;;  %v51_v24 = vld [vmem:[#allocation2 + $0x78] sm:$0xff] }
  0x61   :  { %v2259_v39 = vcombine.high %v253_v34, %v257_v35  ;;  %v2258_v45 = vcombine.low %v253_v34, %v257_v35 }
  0x63   :  { %1662 = vmatpush1.bf16.msra.mxu0 %v2192_v41  ;;  %1744 = vmatpush1.bf16.msra.mxu1 %v2194_v42  ;;  %v264_v41 = vld [vmem:[#allocation2 + $0x720] sm:$0xff]  ;;  %v261_v42 = vld [vmem:[#allocation2 + $0x708] sm:$0xff] }
  0x64   :  { %1663 = vmatprep.subr.bf16.mxu0 %v2201_v43  ;;  %1745 = vmatprep.subr.bf16.mxu1 %v2203_v44  ;;  %v265_v43 = vld [vmem:[#allocation2 + $0x728] sm:$0xff]  ;;  %v2256_v44 = vcombine.low %v252_v32, %v256_v33  ;;  %v2265_v46 = vcombine.high %v260_v40, %v264_v41  ;;  %v59_v32 = vld [vmem:[#allocation2 + $0xb8] sm:$0xff] }
  0x65   :  { %v2267_v47 = vcombine.high %v261_v42, %v265_v43  ;;  %v2266_v53 = vcombine.low %v261_v42, %v265_v43 }
  0x67   :  { %1664 = vmatpush1.bf16.msra.mxu0 %v2200_v49  ;;  %1746 = vmatpush1.bf16.msra.mxu1 %v2202_v50  ;;  %v272_v49 = vld [vmem:[#allocation2 + $0x760] sm:$0xff]  ;;  %v269_v50 = vld [vmem:[#allocation2 + $0x748] sm:$0xff] }
  0x68   :  { %1665 = vmatprep.subr.bf16.mxu0 %v2209_v51  ;;  %1747 = vmatprep.subr.bf16.mxu1 %v2211_v52  ;;  %v273_v51 = vld [vmem:[#allocation2 + $0x768] sm:$0xff]  ;;  %v2264_v52 = vcombine.low %v260_v40, %v264_v41  ;;  %v2273_v54 = vcombine.high %v268_v48, %v272_v49  ;;  %v67_v40 = vld [vmem:[#allocation2 + $0xf8] sm:$0xff] }
  0x69   :  { %v2275_v55 = vcombine.high %v269_v50, %v273_v51  ;;  %v2274_v62 = vcombine.low %v269_v50, %v273_v51 }
  0x6b   :  { %1666 = vmatpush1.bf16.msra.mxu0 %v2208_v58  ;;  %1748 = vmatpush1.bf16.msra.mxu1 %v2210_v59  ;;  %v280_v58 = vld [vmem:[#allocation2 + $0x7a0] sm:$0xff]  ;;  %v277_v59 = vld [vmem:[#allocation2 + $0x788] sm:$0xff] }
  0x6c   :  { %1667 = vmatprep.subr.bf16.mxu0 %v2217_v60  ;;  %1749 = vmatprep.subr.bf16.mxu1 %v2219_v61  ;;  %v281_v60 = vld [vmem:[#allocation2 + $0x7a8] sm:$0xff]  ;;  %v2272_v61 = vcombine.low %v268_v48, %v272_v49  ;;  %v2281_v63 = vcombine.high %v276_v56, %v280_v58  ;;  %v75_v48 = vld [vmem:[#allocation2 + $0x138] sm:$0xff] }
  0x6d   :  { %v2283_v0 = vcombine.high %v277_v59, %v281_v60  ;;  %v2282_v6 = vcombine.low %v277_v59, %v281_v60 }
  0x6f   :  { %1668 = vmatpush1.bf16.msra.mxu0 %v2216_v2  ;;  %1750 = vmatpush1.bf16.msra.mxu1 %v2218_v3  ;;  %v288_v2 = vld [vmem:[#allocation2 + $0x7e0] sm:$0xff]  ;;  %v285_v3 = vld [vmem:[#allocation2 + $0x7c8] sm:$0xff] }
  0x70   :  { %1669 = vmatprep.subr.bf16.mxu0 %v2225_v4  ;;  %1751 = vmatprep.subr.bf16.mxu1 %v2227_v5  ;;  %v289_v4 = vld [vmem:[#allocation2 + $0x7e8] sm:$0xff]  ;;  %v2280_v5 = vcombine.low %v276_v56, %v280_v58  ;;  %v2289_v7 = vcombine.high %v284_v1, %v288_v2 }
  0x71   :  { %v2291_v8 = vcombine.high %v285_v3, %v289_v4  ;;  %v2290_v16 = vcombine.low %v285_v3, %v289_v4 }
  0x73   :  { %1670 = vmatpush1.bf16.msra.mxu0 %v2224_v10  ;;  %1752 = vmatpush1.bf16.msra.mxu1 %v2226_v11  ;;  %v42_v10 = vld [vmem:[#allocation2 + $0x30] sm:$0xff]  ;;  %v39_v11 = vld [vmem:[#allocation2 + $0x18] sm:$0xff] }
  0x74   :  { %1671 = vmatprep.subr.bf16.mxu0 %v2233_v13  ;;  %1753 = vmatprep.subr.bf16.mxu1 %v2235_v14  ;;  %v43_v13 = vld [vmem:[#allocation2 + $0x38] sm:$0xff]  ;;  %v2288_v14 = vcombine.low %v284_v1, %v288_v2  ;;  %v2045_v17 = vcombine.high %v38_v9, %v42_v10  ;;  %v2044_v25 = vcombine.low %v38_v9, %v42_v10 }
  0x75   :  { %v2047_v18 = vcombine.high %v39_v11, %v43_v13  ;;  %v2046_v26 = vcombine.low %v39_v11, %v43_v13 }
  0x77   :  { %1672 = vmatpush1.bf16.msra.mxu0 %v2232_v19  ;;  %1754 = vmatpush1.bf16.msra.mxu1 %v2234_v20  ;;  %v46_v19 = vld [vmem:[#allocation2 + $0x50] sm:$0xff] }
  0x78   :  { %1673 = vmatprep.subr.bf16.mxu0 %v2241_v21  ;;  %1755 = vmatprep.subr.bf16.mxu1 %v2243_v23  ;;  %v50_v20 = vld [vmem:[#allocation2 + $0x70] sm:$0xff]  ;;  %v2424_v21 = vpack.c.bf16 %v30_v15, %v30_v15  ;;  %v47_v23 = vld [vmem:[#allocation2 + $0x58] sm:$0xff] }
  0x79   :  { %v2053_v27 = vcombine.high %v46_v19, %v50_v20  ;;  %v2052_v33 = vcombine.low %v46_v19, %v50_v20  ;;  %v2054_v34 = vcombine.low %v47_v23, %v51_v24  ;;  %v106_v15 = vld [vmem:[#allocation2 + $0x230] sm:$0xff] }
  0x7b   :  { %1674 = vmatpush1.bf16.msra.mxu0 %v2240_v28  ;;  %1756 = vmatpush1.bf16.msra.mxu1 %v2242_v29  ;;  %v2055_v28 = vcombine.high %v47_v23, %v51_v24  ;;  %v54_v29 = vld [vmem:[#allocation2 + $0x90] sm:$0xff] }
  0x7c   :  { %1675 = vmatprep.subr.bf16.mxu0 %v2249_v30  ;;  %1757 = vmatprep.subr.bf16.mxu1 %v2251_v31  ;;  %v58_v30 = vld [vmem:[#allocation2 + $0xb0] sm:$0xff]  ;;  %v55_v31 = vld [vmem:[#allocation2 + $0x98] sm:$0xff] }
  0x7d   :  { %v2061_v35 = vcombine.high %v54_v29, %v58_v30  ;;  %v2060_v41 = vcombine.low %v54_v29, %v58_v30  ;;  %v2062_v42 = vcombine.low %v55_v31, %v59_v32  ;;  %v110_v24 = vld [vmem:[#allocation2 + $0x250] sm:$0xff] }
  0x7f   :  { %1676 = vmatpush1.bf16.msra.mxu0 %v2248_v36  ;;  %1758 = vmatpush1.bf16.msra.mxu1 %v2250_v37  ;;  %v2063_v36 = vcombine.high %v55_v31, %v59_v32  ;;  %v62_v37 = vld [vmem:[#allocation2 + $0xd0] sm:$0xff] }
  0x80   :  { %1677 = vmatprep.subr.bf16.mxu0 %v2257_v38  ;;  %1759 = vmatprep.subr.bf16.mxu1 %v2259_v39  ;;  %v66_v38 = vld [vmem:[#allocation2 + $0xf0] sm:$0xff]  ;;  %v63_v39 = vld [vmem:[#allocation2 + $0xd8] sm:$0xff] }
  0x81   :  { %v2069_v43 = vcombine.high %v62_v37, %v66_v38  ;;  %v2068_v49 = vcombine.low %v62_v37, %v66_v38  ;;  %v2070_v50 = vcombine.low %v63_v39, %v67_v40  ;;  %v118_v32 = vld [vmem:[#allocation2 + $0x290] sm:$0xff] }
  0x83   :  { %1678 = vmatpush1.bf16.msra.mxu0 %v2256_v44  ;;  %1760 = vmatpush1.bf16.msra.mxu1 %v2258_v45  ;;  %v2071_v44 = vcombine.high %v63_v39, %v67_v40  ;;  %v70_v45 = vld [vmem:[#allocation2 + $0x110] sm:$0xff] }
  0x84   :  { %1679 = vmatprep.subr.bf16.mxu0 %v2265_v46  ;;  %1761 = vmatprep.subr.bf16.mxu1 %v2267_v47  ;;  %v74_v46 = vld [vmem:[#allocation2 + $0x130] sm:$0xff]  ;;  %v71_v47 = vld [vmem:[#allocation2 + $0x118] sm:$0xff] }
  0x85   :  { %v2077_v51 = vcombine.high %v70_v45, %v74_v46  ;;  %v2076_v56 = vcombine.low %v70_v45, %v74_v46  ;;  %v2078_v58 = vcombine.low %v71_v47, %v75_v48  ;;  %v126_v40 = vld [vmem:[#allocation2 + $0x2d0] sm:$0xff] }
  0x87   :  { %1680 = vmatpush1.bf16.msra.mxu0 %v2264_v52  ;;  %1762 = vmatpush1.bf16.msra.mxu1 %v2266_v53  ;;  %v78_v52 = vld [vmem:[#allocation2 + $0x150] sm:$0xff] }
  0x88   :  { %1681 = vmatprep.subr.bf16.mxu0 %v2273_v54  ;;  %1763 = vmatprep.subr.bf16.mxu1 %v2275_v55  ;;  %v82_v53 = vld [vmem:[#allocation2 + $0x170] sm:$0xff]  ;;  %v79_v54 = vld [vmem:[#allocation2 + $0x158] sm:$0xff] }
  0x89   :  { %v83_v55 = vld [vmem:[#allocation2 + $0x178] sm:$0xff]  ;;  %v2085_v59 = vcombine.high %v78_v52, %v82_v53  ;;  %v2084_v1 = vcombine.low %v78_v52, %v82_v53 }
  0x8a   :  { %v2087_v60 = vcombine.high %v79_v54, %v83_v55  ;;  %v2086_v2 = vcombine.low %v79_v54, %v83_v55  ;;  %v142_v55 = vld [vmem:[#allocation2 + $0x350] sm:$0xff] }
  0x8b   :  { %1682 = vmatpush1.bf16.msra.mxu0 %v2272_v61  ;;  %1764 = vmatpush1.bf16.msra.mxu1 %v2274_v62  ;;  %v86_v61 = vld [vmem:[#allocation2 + $0x190] sm:$0xff] }
  0x8c   :  { %1683 = vmatprep.subr.bf16.mxu0 %v2281_v63  ;;  %1765 = vmatprep.subr.bf16.mxu1 %v2283_v0  ;;  %v90_v62 = vld [vmem:[#allocation2 + $0x1b0] sm:$0xff]  ;;  %v87_v63 = vld [vmem:[#allocation2 + $0x198] sm:$0xff] }
  0x8d   :  { %v91_v0 = vld [vmem:[#allocation2 + $0x1b8] sm:$0xff]  ;;  %v2093_v3 = vcombine.high %v86_v61, %v90_v62  ;;  %v2092_v9 = vcombine.low %v86_v61, %v90_v62 }
  0x8e   :  { %v2095_v4 = vcombine.high %v87_v63, %v91_v0  ;;  %v2094_v10 = vcombine.low %v87_v63, %v91_v0  ;;  %v150_v0 = vld [vmem:[#allocation2 + $0x390] sm:$0xff] }
  0x8f   :  { %1684 = vmatpush1.bf16.msra.mxu0 %v2280_v5  ;;  %1766 = vmatpush1.bf16.msra.mxu1 %v2282_v6  ;;  %v94_v5 = vld [vmem:[#allocation2 + $0x1d0] sm:$0xff] }
  0x90   :  { %1685 = vmatprep.subr.bf16.mxu0 %v2289_v7  ;;  %1767 = vmatprep.subr.bf16.mxu1 %v2291_v8  ;;  %v98_v6 = vld [vmem:[#allocation2 + $0x1f0] sm:$0xff]  ;;  %v95_v7 = vld [vmem:[#allocation2 + $0x1d8] sm:$0xff] }
  0x91   :  { %v99_v8 = vld [vmem:[#allocation2 + $0x1f8] sm:$0xff]  ;;  %v2101_v11 = vcombine.high %v94_v5, %v98_v6 }
  0x92   :  { %v2103_v13 = vcombine.high %v95_v7, %v99_v8  ;;  %v2102_v19 = vcombine.low %v95_v7, %v99_v8  ;;  %v158_v8 = vld [vmem:[#allocation2 + $0x3d0] sm:$0xff] }
  0x93   :  { %1686 = vmatpush1.bf16.msra.mxu0 %v2288_v14  ;;  %1768 = vmatpush1.bf16.msra.mxu1 %v2290_v16  ;;  %v102_v14 = vld [vmem:[#allocation2 + $0x210] sm:$0xff]  ;;  %v103_v16 = vld [vmem:[#allocation2 + $0x218] sm:$0xff] }
  0x94   :  { %1778 = vmatprep.subr.bf16.mxu0 %v2045_v17  ;;  %1860 = vmatprep.subr.bf16.mxu1 %v2047_v18  ;;  %v107_v17 = vld [vmem:[#allocation2 + $0x238] sm:$0xff]  ;;  %v2100_v18 = vcombine.low %v94_v5, %v98_v6  ;;  %v2109_v20 = vcombine.high %v102_v14, %v106_v15 }
  0x95   :  { %v2111_v23 = vcombine.high %v103_v16, %v107_v17  ;;  %v2110_v29 = vcombine.low %v103_v16, %v107_v17  ;;  %v166_v17 = vld [vmem:[#allocation2 + $0x410] sm:$0xff] }
  0x96   :  { %1688 = vmatmul.mubr.bf16.vlgmr.msra.gmra.mrb[0].mxu0 %v2424_v21  ;;  %1770 = vmatmul.mubr.bf16.vlgmr.msra.gmra.mrb[0].mxu1 %v2424_v21 }
  0x97   :  { %1779 = vmatpush1.bf16.msra.mxu0 %v2044_v25  ;;  %1861 = vmatpush1.bf16.msra.mxu1 %v2046_v26  ;;  %v114_v25 = vld [vmem:[#allocation2 + $0x270] sm:$0xff]  ;;  %v111_v26 = vld [vmem:[#allocation2 + $0x258] sm:$0xff] }
  0x98   :  { %1780 = vmatprep.subr.bf16.mxu0 %v2053_v27  ;;  %1862 = vmatprep.subr.bf16.mxu1 %v2055_v28  ;;  %v115_v27 = vld [vmem:[#allocation2 + $0x278] sm:$0xff]  ;;  %v2108_v28 = vcombine.low %v102_v14, %v106_v15  ;;  %v2117_v30 = vcombine.high %v110_v24, %v114_v25 }
  0x99   :  { %1810 = vmatprep.mubr.bf16.mxu0 %v2403_v57  ;;  %1892 = vmatprep.mubr.bf16.mxu1 %v2403_v57  ;;  %v2079_v57 = vcombine.high %v71_v47, %v75_v48  ;;  %v2119_v31 = vcombine.high %v111_v26, %v115_v27  ;;  %v2118_v37 = vcombine.low %v111_v26, %v115_v27  ;;  %v134_v48 = vld [vmem:[#allocation2 + $0x310] sm:$0xff] }
  0x9a   :  { %v174_v27 = vld [vmem:[#allocation2 + $0x450] sm:$0xff] }
  0x9b   :  { %1781 = vmatpush1.bf16.msra.mxu0 %v2052_v33  ;;  %1863 = vmatpush1.bf16.msra.mxu1 %v2054_v34  ;;  %v122_v33 = vld [vmem:[#allocation2 + $0x2b0] sm:$0xff]  ;;  %v119_v34 = vld [vmem:[#allocation2 + $0x298] sm:$0xff] }
  0x9c   :  { %1782 = vmatprep.subr.bf16.mxu0 %v2061_v35  ;;  %1864 = vmatprep.subr.bf16.mxu1 %v2063_v36  ;;  %v123_v35 = vld [vmem:[#allocation2 + $0x2b8] sm:$0xff]  ;;  %v2116_v36 = vcombine.low %v110_v24, %v114_v25  ;;  %v2125_v38 = vcombine.high %v118_v32, %v122_v33 }
  0x9d   :  { %v2127_v39 = vcombine.high %v119_v34, %v123_v35  ;;  %v2126_v45 = vcombine.low %v119_v34, %v123_v35  ;;  %v182_v35 = vld [vmem:[#allocation2 + $0x490] sm:$0xff] }
  0x9f   :  { %1783 = vmatpush1.bf16.msra.mxu0 %v2060_v41  ;;  %1865 = vmatpush1.bf16.msra.mxu1 %v2062_v42  ;;  %v130_v41 = vld [vmem:[#allocation2 + $0x2f0] sm:$0xff]  ;;  %v127_v42 = vld [vmem:[#allocation2 + $0x2d8] sm:$0xff] }
  0xa0   :  { %1784 = vmatprep.subr.bf16.mxu0 %v2069_v43  ;;  %1866 = vmatprep.subr.bf16.mxu1 %v2071_v44  ;;  %v131_v43 = vld [vmem:[#allocation2 + $0x2f8] sm:$0xff]  ;;  %v2124_v44 = vcombine.low %v118_v32, %v122_v33  ;;  %v2133_v46 = vcombine.high %v126_v40, %v130_v41 }
  0xa1   :  { %v2135_v47 = vcombine.high %v127_v42, %v131_v43  ;;  %v2134_v52 = vcombine.low %v127_v42, %v131_v43  ;;  %v190_v43 = vld [vmem:[#allocation2 + $0x4d0] sm:$0xff] }
  0xa3   :  { %1785 = vmatpush1.bf16.msra.mxu0 %v2068_v49  ;;  %1867 = vmatpush1.bf16.msra.mxu1 %v2070_v50  ;;  %v138_v49 = vld [vmem:[#allocation2 + $0x330] sm:$0xff]  ;;  %v135_v50 = vld [vmem:[#allocation2 + $0x318] sm:$0xff] }
  0xa4   :  { %1786 = vmatprep.subr.bf16.mxu0 %v2077_v51  ;;  %1868 = vmatprep.subr.bf16.mxu1 %v2079_v57  ;;  %v139_v51 = vld [vmem:[#allocation2 + $0x338] sm:$0xff]  ;;  %v2132_v57 = vcombine.low %v126_v40, %v130_v41  ;;  %v2141_v53 = vcombine.high %v134_v48, %v138_v49 }
  0xa5   :  { %v2143_v54 = vcombine.high %v135_v50, %v139_v51  ;;  %v2142_v61 = vcombine.low %v135_v50, %v139_v51  ;;  %v198_v50 = vld [vmem:[#allocation2 + $0x510] sm:$0xff] }
  0xa6   :  { %v202_v51 = vld [vmem:[#allocation2 + $0x530] sm:$0xff] }
  0xa7   :  { %1787 = vmatpush1.bf16.msra.mxu0 %v2076_v56  ;;  %1869 = vmatpush1.bf16.msra.mxu1 %v2078_v58  ;;  %v146_v56 = vld [vmem:[#allocation2 + $0x370] sm:$0xff]  ;;  %v143_v58 = vld [vmem:[#allocation2 + $0x358] sm:$0xff] }
  0xa8   :  { %1788 = vmatprep.subr.bf16.mxu0 %v2085_v59  ;;  %1870 = vmatprep.subr.bf16.mxu1 %v2087_v60  ;;  %v147_v59 = vld [vmem:[#allocation2 + $0x378] sm:$0xff]  ;;  %v2140_v60 = vcombine.low %v134_v48, %v138_v49  ;;  %v2149_v62 = vcombine.high %v142_v55, %v146_v56 }
  0xa9   :  { %v2151_v63 = vcombine.high %v143_v58, %v147_v59  ;;  %v2150_v5 = vcombine.low %v143_v58, %v147_v59  ;;  %v210_v58 = vld [vmem:[#allocation2 + $0x570] sm:$0xff]  ;;  %v207_v59 = vld [vmem:[#allocation2 + $0x558] sm:$0xff] }
  0xab   :  { %1789 = vmatpush1.bf16.msra.mxu0 %v2084_v1  ;;  %1871 = vmatpush1.bf16.msra.mxu1 %v2086_v2  ;;  %v154_v1 = vld [vmem:[#allocation2 + $0x3b0] sm:$0xff]  ;;  %v151_v2 = vld [vmem:[#allocation2 + $0x398] sm:$0xff] }
  0xac   :  { %1790 = vmatprep.subr.bf16.mxu0 %v2093_v3  ;;  %1872 = vmatprep.subr.bf16.mxu1 %v2095_v4  ;;  %v155_v3 = vld [vmem:[#allocation2 + $0x3b8] sm:$0xff]  ;;  %v2148_v4 = vcombine.low %v142_v55, %v146_v56  ;;  %v2157_v6 = vcombine.high %v150_v0, %v154_v1  ;;  %v2205_v55 = vcombine.high %v198_v50, %v202_v51  ;;  %v206_v56 = vld [vmem:[#allocation2 + $0x550] sm:$0xff] }
  0xad   :  { %v2159_v7 = vcombine.high %v151_v2, %v155_v3  ;;  %v2158_v14 = vcombine.low %v151_v2, %v155_v3  ;;  %v218_v2 = vld [vmem:[#allocation2 + $0x5b0] sm:$0xff]  ;;  %v215_v3 = vld [vmem:[#allocation2 + $0x598] sm:$0xff] }
  0xaf   :  { %1791 = vmatpush1.bf16.msra.mxu0 %v2092_v9  ;;  %1873 = vmatpush1.bf16.msra.mxu1 %v2094_v10  ;;  %v162_v9 = vld [vmem:[#allocation2 + $0x3f0] sm:$0xff]  ;;  %v159_v10 = vld [vmem:[#allocation2 + $0x3d8] sm:$0xff] }
  0xb0   :  { %1792 = vmatprep.subr.bf16.mxu0 %v2101_v11  ;;  %1874 = vmatprep.subr.bf16.mxu1 %v2103_v13  ;;  %v163_v11 = vld [vmem:[#allocation2 + $0x3f8] sm:$0xff]  ;;  %v2156_v13 = vcombine.low %v150_v0, %v154_v1  ;;  %v2165_v15 = vcombine.high %v158_v8, %v162_v9  ;;  %v214_v1 = vld [vmem:[#allocation2 + $0x590] sm:$0xff] }
  0xb1   :  { %v2167_v16 = vcombine.high %v159_v10, %v163_v11  ;;  %v2166_v24 = vcombine.low %v159_v10, %v163_v11  ;;  %v226_v10 = vld [vmem:[#allocation2 + $0x5f0] sm:$0xff]  ;;  %v223_v11 = vld [vmem:[#allocation2 + $0x5d8] sm:$0xff] }
  0xb3   :  { %1793 = vmatpush1.bf16.msra.mxu0 %v2100_v18  ;;  %1875 = vmatpush1.bf16.msra.mxu1 %v2102_v19  ;;  %v170_v18 = vld [vmem:[#allocation2 + $0x430] sm:$0xff]  ;;  %v167_v19 = vld [vmem:[#allocation2 + $0x418] sm:$0xff] }
  0xb4   :  { %1794 = vmatprep.subr.bf16.mxu0 %v2109_v20  ;;  %1876 = vmatprep.subr.bf16.mxu1 %v2111_v23  ;;  %v171_v20 = vld [vmem:[#allocation2 + $0x438] sm:$0xff]  ;;  %v2164_v23 = vcombine.low %v158_v8, %v162_v9  ;;  %v2173_v25 = vcombine.high %v166_v17, %v170_v18  ;;  %v222_v9 = vld [vmem:[#allocation2 + $0x5d0] sm:$0xff] }
  0xb5   :  { %v2175_v26 = vcombine.high %v167_v19, %v171_v20  ;;  %v2174_v32 = vcombine.low %v167_v19, %v171_v20  ;;  %v234_v19 = vld [vmem:[#allocation2 + $0x630] sm:$0xff]  ;;  %v231_v20 = vld [vmem:[#allocation2 + $0x618] sm:$0xff] }
  0xb7   :  { %1795 = vmatpush1.bf16.msra.mxu0 %v2108_v28  ;;  %1877 = vmatpush1.bf16.msra.mxu1 %v2110_v29  ;;  %v178_v28 = vld [vmem:[#allocation2 + $0x470] sm:$0xff]  ;;  %v175_v29 = vld [vmem:[#allocation2 + $0x458] sm:$0xff] }
  0xb8   :  { %1796 = vmatprep.subr.bf16.mxu0 %v2117_v30  ;;  %1878 = vmatprep.subr.bf16.mxu1 %v2119_v31  ;;  %v179_v30 = vld [vmem:[#allocation2 + $0x478] sm:$0xff]  ;;  %v2172_v31 = vcombine.low %v166_v17, %v170_v18  ;;  %v2181_v33 = vcombine.high %v174_v27, %v178_v28  ;;  %v230_v18 = vld [vmem:[#allocation2 + $0x610] sm:$0xff] }
  0xb9   :  { %v2183_v34 = vcombine.high %v175_v29, %v179_v30  ;;  %v2182_v40 = vcombine.low %v175_v29, %v179_v30  ;;  %v242_v29 = vld [vmem:[#allocation2 + $0x670] sm:$0xff]  ;;  %v239_v30 = vld [vmem:[#allocation2 + $0x658] sm:$0xff] }
  0xbb   :  { %1797 = vmatpush1.bf16.msra.mxu0 %v2116_v36  ;;  %1879 = vmatpush1.bf16.msra.mxu1 %v2118_v37  ;;  %v186_v36 = vld [vmem:[#allocation2 + $0x4b0] sm:$0xff]  ;;  %v183_v37 = vld [vmem:[#allocation2 + $0x498] sm:$0xff] }
  0xbc   :  { %1798 = vmatprep.subr.bf16.mxu0 %v2125_v38  ;;  %1880 = vmatprep.subr.bf16.mxu1 %v2127_v39  ;;  %v187_v38 = vld [vmem:[#allocation2 + $0x4b8] sm:$0xff]  ;;  %v2180_v39 = vcombine.low %v174_v27, %v178_v28  ;;  %v2189_v41 = vcombine.high %v182_v35, %v186_v36  ;;  %v238_v28 = vld [vmem:[#allocation2 + $0x650] sm:$0xff] }
  0xbd   :  { %v2191_v42 = vcombine.high %v183_v37, %v187_v38 }
  0xbf   :  { %1799 = vmatpush1.bf16.msra.mxu0 %v2124_v44  ;;  %1881 = vmatpush1.bf16.msra.mxu1 %v2126_v45  ;;  %v194_v44 = vld [vmem:[#allocation2 + $0x4f0] sm:$0xff]  ;;  %v191_v45 = vld [vmem:[#allocation2 + $0x4d8] sm:$0xff] }
  0xc0   :  { %1800 = vmatprep.subr.bf16.mxu0 %v2133_v46  ;;  %1882 = vmatprep.subr.bf16.mxu1 %v2135_v47  ;;  %v195_v46 = vld [vmem:[#allocation2 + $0x4f8] sm:$0xff]  ;;  %v2188_v47 = vcombine.low %v182_v35, %v186_v36  ;;  %v2197_v48 = vcombine.high %v190_v43, %v194_v44  ;;  %v246_v36 = vld [vmem:[#allocation2 + $0x690] sm:$0xff] }
  0xc1   :  { %v2199_v49 = vcombine.high %v191_v45, %v195_v46 }
  0xc3   :  { %1801 = vmatpush1.bf16.msra.mxu0 %v2132_v57  ;;  %1883 = vmatpush1.bf16.msra.mxu1 %v2134_v52  ;;  %v199_v57 = vld [vmem:[#allocation2 + $0x518] sm:$0xff] }
  0xc4   :  { %1802 = vmatprep.subr.bf16.mxu0 %v2141_v53  ;;  %1884 = vmatprep.subr.bf16.mxu1 %v2143_v54  ;;  %v203_v52 = vld [vmem:[#allocation2 + $0x538] sm:$0xff]  ;;  %v2196_v53 = vcombine.low %v190_v43, %v194_v44  ;;  %v2198_v54 = vcombine.low %v191_v45, %v195_v46  ;;  %v254_v44 = vld [vmem:[#allocation2 + $0x6d0] sm:$0xff] }
  0xc5   :  { %v258_v45 = vld [vmem:[#allocation2 + $0x6f0] sm:$0xff]  ;;  %v255_v46 = vld [vmem:[#allocation2 + $0x6d8] sm:$0xff] }
  0xc7   :  { %1803 = vmatpush1.bf16.msra.mxu0 %v2140_v60  ;;  %1885 = vmatpush1.bf16.msra.mxu1 %v2142_v61  ;;  %v211_v60 = vld [vmem:[#allocation2 + $0x578] sm:$0xff]  ;;  %v2204_v61 = vcombine.low %v198_v50, %v202_v51  ;;  %v262_v51 = vld [vmem:[#allocation2 + $0x710] sm:$0xff] }
  0xc8   :  { %1804 = vmatprep.subr.bf16.mxu0 %v2149_v62  ;;  %1886 = vmatprep.subr.bf16.mxu1 %v2151_v63  ;;  %v2206_v62 = vcombine.low %v199_v57, %v203_v52  ;;  %v2213_v63 = vcombine.high %v206_v56, %v210_v58  ;;  %v2215_v0 = vcombine.high %v207_v59, %v211_v60 }
  0xcb   :  { %1805 = vmatpush1.bf16.msra.mxu0 %v2148_v4  ;;  %1887 = vmatpush1.bf16.msra.mxu1 %v2150_v5  ;;  %v219_v4 = vld [vmem:[#allocation2 + $0x5b8] sm:$0xff]  ;;  %v2212_v5 = vcombine.low %v206_v56, %v210_v58  ;;  %v270_v58 = vld [vmem:[#allocation2 + $0x750] sm:$0xff] }
  0xcc   :  { %1806 = vmatprep.subr.bf16.mxu0 %v2157_v6  ;;  %1888 = vmatprep.subr.bf16.mxu1 %v2159_v7  ;;  %v2214_v6 = vcombine.low %v207_v59, %v211_v60  ;;  %v2221_v7 = vcombine.high %v214_v1, %v218_v2  ;;  %v2223_v8 = vcombine.high %v215_v3, %v219_v4  ;;  %v274_v59 = vld [vmem:[#allocation2 + $0x770] sm:$0xff]  ;;  %v271_v60 = vld [vmem:[#allocation2 + $0x758] sm:$0xff] }
  0xcf   :  { %1807 = vmatpush1.bf16.msra.mxu0 %v2156_v13  ;;  %1889 = vmatpush1.bf16.msra.mxu1 %v2158_v14  ;;  %v227_v13 = vld [vmem:[#allocation2 + $0x5f8] sm:$0xff]  ;;  %v2220_v14 = vcombine.low %v214_v1, %v218_v2  ;;  %v278_v2 = vld [vmem:[#allocation2 + $0x790] sm:$0xff] }
  0xd0   :  { %1808 = vmatprep.subr.bf16.mxu0 %v2165_v15  ;;  %1890 = vmatprep.subr.bf16.mxu1 %v2167_v16  ;;  %v2222_v15 = vcombine.low %v215_v3, %v219_v4  ;;  %v2229_v16 = vcombine.high %v222_v9, %v226_v10  ;;  %v2231_v17 = vcombine.high %v223_v11, %v227_v13  ;;  %v282_v3 = vld [vmem:[#allocation2 + $0x7b0] sm:$0xff]  ;;  %v279_v4 = vld [vmem:[#allocation2 + $0x798] sm:$0xff] }
  0xd3   :  { %1809 = vmatpush1.bf16.msra.mxu0 %v2164_v23  ;;  %1891 = vmatpush1.bf16.msra.mxu1 %v2166_v24  ;;  %v235_v23 = vld [vmem:[#allocation2 + $0x638] sm:$0xff]  ;;  %v2228_v24 = vcombine.low %v222_v9, %v226_v10  ;;  %v286_v10 = vld [vmem:[#allocation2 + $0x7d0] sm:$0xff] }
  0xd4   :  { %1819 = vmatprep.subr.bf16.mxu0 %v2173_v25  ;;  %1901 = vmatprep.subr.bf16.mxu1 %v2175_v26  ;;  %v2230_v25 = vcombine.low %v223_v11, %v227_v13  ;;  %v2237_v26 = vcombine.high %v230_v18, %v234_v19  ;;  %v2239_v27 = vcombine.high %v231_v20, %v235_v23  ;;  %v290_v11 = vld [vmem:[#allocation2 + $0x7f0] sm:$0xff]  ;;  %v287_v13 = vld [vmem:[#allocation2 + $0x7d8] sm:$0xff] }
  0xd6   :  { %1811 = vmatmul.mubr.bf16.vlgmr.msra.gmra.mrb[4].mxu0 %v2410_v12  ;;  %1893 = vmatmul.mubr.bf16.vlgmr.msra.gmra.mrb[4].mxu1 %v2410_v12  ;;  %v2190_v12 = vcombine.low %v183_v37, %v187_v38  ;;  %v250_v37 = vld [vmem:[#allocation2 + $0x6b0] sm:$0xff]  ;;  %v247_v38 = vld [vmem:[#allocation2 + $0x698] sm:$0xff] }
  0xd7   :  { %1820 = vmatpush1.bf16.msra.mxu0 %v2172_v31  ;;  %1902 = vmatpush1.bf16.msra.mxu1 %v2174_v32  ;;  %v243_v31 = vld [vmem:[#allocation2 + $0x678] sm:$0xff]  ;;  %v2236_v32 = vcombine.low %v230_v18, %v234_v19  ;;  %v2292_v19 = vcombine.low %v286_v10, %v290_v11 }
  0xd8   :  { %1821 = vmatprep.subr.bf16.mxu0 %v2181_v33  ;;  %1903 = vmatprep.subr.bf16.mxu1 %v2183_v34  ;;  %v2238_v33 = vcombine.low %v231_v20, %v235_v23  ;;  %v2245_v34 = vcombine.high %v238_v28, %v242_v29  ;;  %v2247_v35 = vcombine.high %v239_v30, %v243_v31 }
  0xd9   :  { %1851 = vmatprep.mubr.bf16.mxu0 %v2415_v22  ;;  %1933 = vmatprep.mubr.bf16.mxu1 %v2415_v22  ;;  %v2207_v22 = vcombine.high %v199_v57, %v203_v52  ;;  %v266_v57 = vld [vmem:[#allocation2 + $0x730] sm:$0xff]  ;;  %v263_v52 = vld [vmem:[#allocation2 + $0x718] sm:$0xff] }
  0xdb   :  { %1822 = vmatpush1.bf16.msra.mxu0 %v2180_v39  ;;  %1904 = vmatpush1.bf16.msra.mxu1 %v2182_v40  ;;  %v251_v39 = vld [vmem:[#allocation2 + $0x6b8] sm:$0xff]  ;;  %v2244_v40 = vcombine.low %v238_v28, %v242_v29 }
  0xdc   :  { %1823 = vmatprep.subr.bf16.mxu0 %v2189_v41  ;;  %1905 = vmatprep.subr.bf16.mxu1 %v2191_v42  ;;  %v2246_v41 = vcombine.low %v239_v30, %v243_v31  ;;  %v2253_v42 = vcombine.high %v246_v36, %v250_v37  ;;  %v2255_v43 = vcombine.high %v247_v38, %v251_v39  ;;  %v294_v31 = vlaneseq }
  0xdf   :  { %1824 = vmatpush1.bf16.msra.mxu0 %v2188_v47  ;;  %1906 = vmatpush1.bf16.msra.mxu1 %v2190_v12  ;;  %v259_v47 = vld [vmem:[#allocation2 + $0x6f8] sm:$0xff]  ;;  %v2252_v12 = vcombine.low %v246_v36, %v250_v37 }
  0xe0   :  { %1825 = vmatprep.subr.bf16.mxu0 %v2197_v48  ;;  %1907 = vmatprep.subr.bf16.mxu1 %v2199_v49  ;;  %v2254_v48 = vcombine.low %v247_v38, %v251_v39  ;;  %v2261_v49 = vcombine.high %v254_v44, %v258_v45  ;;  %v2263_v50 = vcombine.high %v255_v46, %v259_v47 }
  0xe3   :  { %1826 = vmatpush1.bf16.msra.mxu0 %v2196_v53  ;;  %1908 = vmatpush1.bf16.msra.mxu1 %v2198_v54  ;;  %v267_v53 = vld [vmem:[#allocation2 + $0x738] sm:$0xff]  ;;  %v2260_v54 = vcombine.low %v254_v44, %v258_v45 }
  0xe4   :  { %1827 = vmatprep.subr.bf16.mxu0 %v2205_v55  ;;  %1909 = vmatprep.subr.bf16.mxu1 %v2207_v22  ;;  %v2262_v55 = vcombine.low %v255_v46, %v259_v47  ;;  %v2269_v22 = vcombine.high %v262_v51, %v266_v57  ;;  %v2271_v56 = vcombine.high %v263_v52, %v267_v53 }
  0xe7   :  { %1828 = vmatpush1.bf16.msra.mxu0 %v2204_v61  ;;  %1910 = vmatpush1.bf16.msra.mxu1 %v2206_v62  ;;  %v275_v61 = vld [vmem:[#allocation2 + $0x778] sm:$0xff]  ;;  %v2268_v62 = vcombine.low %v262_v51, %v266_v57 }
  0xe8   :  { %1829 = vmatprep.subr.bf16.mxu0 %v2213_v63  ;;  %1911 = vmatprep.subr.bf16.mxu1 %v2215_v0  ;;  %v2270_v63 = vcombine.low %v263_v52, %v267_v53  ;;  %v2277_v0 = vcombine.high %v270_v58, %v274_v59  ;;  %v2279_v1 = vcombine.high %v271_v60, %v275_v61 }
  0xeb   :  { %1830 = vmatpush1.bf16.msra.mxu0 %v2212_v5  ;;  %1912 = vmatpush1.bf16.msra.mxu1 %v2214_v6  ;;  %v283_v5 = vld [vmem:[#allocation2 + $0x7b8] sm:$0xff]  ;;  %v2276_v6 = vcombine.low %v270_v58, %v274_v59 }
  0xec   :  { %1831 = vmatprep.subr.bf16.mxu0 %v2221_v7  ;;  %1913 = vmatprep.subr.bf16.mxu1 %v2223_v8  ;;  %v2278_v7 = vcombine.low %v271_v60, %v275_v61  ;;  %v2285_v8 = vcombine.high %v278_v2, %v282_v3  ;;  %v2287_v9 = vcombine.high %v279_v4, %v283_v5 }
  0xef   :  { %1832 = vmatpush1.bf16.msra.mxu0 %v2220_v14  ;;  %1914 = vmatpush1.bf16.msra.mxu1 %v2222_v15  ;;  %v291_v14 = vld [vmem:[#allocation2 + $0x7f8] sm:$0xff]  ;;  %v2284_v15 = vcombine.low %v278_v2, %v282_v3 }
  0xf0   :  { %1833 = vmatprep.subr.bf16.mxu0 %v2229_v16  ;;  %1915 = vmatprep.subr.bf16.mxu1 %v2231_v17  ;;  %v2286_v16 = vcombine.low %v279_v4, %v283_v5  ;;  %v2293_v17 = vcombine.high %v286_v10, %v290_v11  ;;  %v2295_v18 = vcombine.high %v287_v13, %v291_v14 }
  0xf1   :  { %v2294_v20 = vcombine.low %v287_v13, %v291_v14 }
  0xf3   :  { %1834 = vmatpush1.bf16.msra.mxu0 %v2228_v24  ;;  %1916 = vmatpush1.bf16.msra.mxu1 %v2230_v25 }
  0xf4   :  { %1835 = vmatprep.subr.bf16.mxu0 %v2237_v26  ;;  %1917 = vmatprep.subr.bf16.mxu1 %v2239_v27 }
  0xf7   :  { %1836 = vmatpush1.bf16.msra.mxu0 %v2236_v32  ;;  %1918 = vmatpush1.bf16.msra.mxu1 %v2238_v33  ;;  %v295_v32 = vshrl.u32 %v294_v31, 7 }
  0xf8   :  { %1837 = vmatprep.subr.bf16.mxu0 %v2245_v34  ;;  %1919 = vmatprep.subr.bf16.mxu1 %v2247_v35  ;;  %v292_v34 = vld [vmem:[%s2465_s2] sm:$0xff] }
  0xf9   :  { %v296_v33 = vsub.s32 0, %v295_v32  ;;  %v300_v35 = vsub.s32 1, %v295_v32  ;;  %v312_v36 = vsub.s32 4, %v295_v32  ;;  %v304_v37 = vsub.s32 2, %v295_v32 }
  0xfa   :  { %v308_v38 = vsub.s32 3, %v295_v32  ;;  %v316_v39 = vsub.s32 5, %v295_v32 }
  0xfb   :  { %1838 = vmatpush1.bf16.msra.mxu0 %v2244_v40  ;;  %1920 = vmatpush1.bf16.msra.mxu1 %v2246_v41  ;;  %v297_v40 = vrot.slane %v292_v34, %v296_v33  ;;  %v324_v41 = vsub.s32 7, %v295_v32  ;;  %v313_v44 = vrot.slane %v292_v34, %v312_v36  ;;  %v305_v45 = vrot.slane %v292_v34, %v304_v37 }
  0xfc   :  { %1839 = vmatprep.subr.bf16.mxu0 %v2253_v42  ;;  %1921 = vmatprep.subr.bf16.mxu1 %v2255_v43  ;;  %v301_v42 = vrot.slane %v292_v34, %v300_v35  ;;  %v1951_v43 = vand.u32 127, %v294_v31  ;;  %v309_v46 = vrot.slane %v292_v34, %v308_v38 }
  0xfe   :  { %v1958_v57 = vadd.s32 896, %v1951_v43 }
  0xff   :  { %1840 = vmatpush1.bf16.msra.mxu0 %v2252_v12  ;;  %1922 = vmatpush1.bf16.msra.mxu1 %v2254_v48  ;;  %v317_v12 = vrot.slane %v292_v34, %v316_v39 }
 0x100   :  { %1841 = vmatprep.subr.bf16.mxu0 %v2261_v49  ;;  %1923 = vmatprep.subr.bf16.mxu1 %v2263_v50  ;;  %v325_v49 = vrot.slane %v292_v34, %v324_v41  ;;  %vm1966_vm0 = vcmp.lt.s32.totalorder %v1958_v57, 1000 }
 0x103   :  { %1842 = vmatpush1.bf16.msra.mxu0 %v2260_v54  ;;  %1924 = vmatpush1.bf16.msra.mxu1 %v2262_v55 }
 0x104   :  { %1843 = vmatprep.subr.bf16.mxu0 %v2269_v22  ;;  %1925 = vmatprep.subr.bf16.mxu1 %v2271_v56 }
 0x107   :  { %1844 = vmatpush1.bf16.msra.mxu0 %v2268_v62  ;;  %1926 = vmatpush1.bf16.msra.mxu1 %v2270_v63 }
 0x108   :  { %1845 = vmatprep.subr.bf16.mxu0 %v2277_v0  ;;  %1927 = vmatprep.subr.bf16.mxu1 %v2279_v1 }
 0x10b   :  { %1846 = vmatpush1.bf16.msra.mxu0 %v2276_v6  ;;  %1928 = vmatpush1.bf16.msra.mxu1 %v2278_v7 }
 0x10c   :  { %1847 = vmatprep.subr.bf16.mxu0 %v2285_v8  ;;  %1929 = vmatprep.subr.bf16.mxu1 %v2287_v9 }
 0x10f   :  { %1848 = vmatpush1.bf16.msra.mxu0 %v2284_v15  ;;  %1930 = vmatpush1.bf16.msra.mxu1 %v2286_v16 }
 0x110   :  { %1849 = vmatprep.subr.bf16.mxu0 %v2293_v17  ;;  %1931 = vmatprep.subr.bf16.mxu1 %v2295_v18 }
 0x113   :  { %1850 = vmatpush1.bf16.msra.mxu0 %v2292_v19  ;;  %1932 = vmatpush1.bf16.msra.mxu1 %v2294_v20 }
 0x116   :  { %1852 = vmatmul.mubr.bf16.vlgmr.msra.gmra.mrb[4].mxu0 %v2424_v21  ;;  %1934 = vmatmul.mubr.bf16.vlgmr.msra.gmra.mrb[4].mxu1 %v2424_v21  ;;  %v320_v21 = vsub.s32 6, %v295_v32 }
 0x118   :  { %v321_v47 = vrot.slane %v292_v34, %v320_v21 }
 0x169   :  { %v1689_v23 = vpop.f32.mrb[0].mxu0  ;;  %v1771_v24 = vpop.f32.mrb[0].mxu1 }
 0x16a   :  { %v1691_v25 = vpop.f32.mrb[1].mxu0  ;;  %v1773_v26 = vpop.f32.mrb[1].mxu1  ;;  %v2296_v48 = vadd.f32 %v1689_v23, %v297_v40  ;;  %v2298_v55 = vadd.f32 %v1771_v24, %v305_v45 }
 0x16b   :  { %v1693_v27 = vpop.f32.mrb[2].mxu0  ;;  %v1775_v28 = vpop.f32.mrb[2].mxu1  ;;  %v2297_v50 = vadd.f32 %v1691_v25, %v301_v42  ;;  %v2299_v22 = vadd.f32 %v1773_v26, %v309_v46 }
 0x16c   :  { %v1694_v29 = vpop.f32.mrb[3].mxu0  ;;  %v1776_v30 = vpop.f32.mrb[3].mxu1  ;;  %v1942_v61 = vmax.f32 %v2296_v48, 0.0  ;;  %v1944_v8 = vmax.f32 %v2298_v55, 0.0 }
 0x16d   :  { %v1943_v2 = vmax.f32 %v2297_v50, 0.0  ;;  %v1945_v9 = vmax.f32 %v2299_v22, 0.0 }
 0x1e9   :  { %v1853_v51 = vpop.f32.mrb[4].mxu0  ;;  %v1935_v53 = vpop.f32.mrb[4].mxu1 }
 0x1ea   :  { %v2300_v52 = vadd.f32 %v1853_v51, %v313_v44  ;;  %v1855_v54 = vpop.f32.mrb[5].mxu0  ;;  %v2302_v56 = vadd.f32 %v1935_v53, %v321_v47  ;;  %v1937_v59 = vpop.f32.mrb[5].mxu1 }
 0x1eb   :  { %v2301_v58 = vadd.f32 %v1855_v54, %v317_v12  ;;  %v1857_v60 = vpop.f32.mrb[6].mxu0  ;;  %v2303_v63 = vadd.f32 %v1937_v59, %v325_v49  ;;  %v1939_v0 = vpop.f32.mrb[6].mxu1 }
 0x1ec   :  { %v1946_v62 = vmax.f32 %v2300_v52, 0.0  ;;  %v1858_v1 = vpop.f32.mrb[7].mxu0  ;;  %v1948_v3 = vmax.f32 %v2302_v56, 0.0  ;;  %v1940_v5 = vpop.f32.mrb[7].mxu1 }
 0x1ed   :  { %v1947_v4 = vmax.f32 %v2301_v58, 0.0  ;;  %v1949_v7 = vmax.f32 %v2303_v63, 0.0 }
 0x1ee   :  { %v1975_v6 = vmax.f32 %v1942_v61, %v1946_v62  ;;  %v1977_v13 = vmax.f32 %v1944_v8, %v1948_v3 }
 0x1ef   :  { %v1976_v10 = vmax.f32 %v1943_v2, %v1947_v4  ;;  %v1974_v11 = vsel %vm1966_vm0, %v1949_v7, -1e+30 }
 0x1f0   :  { %v1978_v14 = vmax.f32 %v1945_v9, %v1974_v11 }
 0x1f1   :  { %v1979_v15 = vmax.f32 %v1975_v6, %v1976_v10 }
 0x1f2   :  { %v1980_v16 = vmax.f32 %v1977_v13, %v1978_v14 }
 0x1f4   :  { %v1981_v17 = vmax.f32 %v1979_v15, %v1980_v16 }
 0x1f6   :  { %1982 = vmax.xlane.f32.xlu0 %v1981_v17 }
 0x283   :  { %v1983_v18 = vpop.xlane.xlu0 %1982 }
 0x284   :  { %v1984_v19 = vsub.f32 %v1942_v61, %v1983_v18  ;;  %v1985_v20 = vsub.f32 %v1943_v2, %v1983_v18  ;;  %v1986_v23 = vsub.f32 %v1944_v8, %v1983_v18  ;;  %v1987_v24 = vsub.f32 %v1945_v9, %v1983_v18 }
 0x285   :  { %v1988_v28 = vsub.f32 %v1946_v62, %v1983_v18  ;;  %v1989_v30 = vsub.f32 %v1947_v4, %v1983_v18  ;;  %v1990_v31 = vsub.f32 %v1948_v3, %v1983_v18  ;;  %v1991_v33 = vsub.f32 %v1974_v11, %v1983_v18 }
 0x286   :  { %v1992_v25 = vmul.f32 1.442695, %v1984_v19  ;;  %v1994_v26 = vmul.f32 1.442695, %v1985_v20  ;;  %v1996_v27 = vmul.f32 1.442695, %v1986_v23 }
 0x287   :  { %v1998_v29 = vmul.f32 1.442695, %v1987_v24  ;;  %v2000_v32 = vmul.f32 1.442695, %v1988_v28  ;;  %v2002_v34 = vmul.f32 1.442695, %v1989_v30 }
 0x288   :  { %2323 = vpow2.f32 %v1992_v25  ;;  %v2004_v35 = vmul.f32 1.442695, %v1990_v31  ;;  %v2006_v36 = vmul.f32 1.442695, %v1991_v33 }
 0x289   :  { %2325 = vpow2.f32 %v1994_v26 }
 0x28a   :  { %2327 = vpow2.f32 %v1996_v27 }
 0x28b   :  { %2329 = vpow2.f32 %v1998_v29 }
 0x28c   :  { %2331 = vpow2.f32 %v2000_v32 }
 0x28d   :  { %2333 = vpow2.f32 %v2002_v34 }
 0x28e   :  { %2335 = vpow2.f32 %v2004_v35 }
 0x28f   :  { %2337 = vpow2.f32 %v2006_v36 }
 0x292   :  { %v2324_v37 = vpop.eup %2323 }
 0x293   :  { %v2326_v38 = vpop.eup %2325 }
 0x294   :  { %v2008_v21 = vadd.f32 %v2326_v38, %v2324_v37  ;;  %v2328_v39 = vpop.eup %2327 }
 0x295   :  { %v2330_v41 = vpop.eup %2329 }
 0x296   :  { %v2009_v40 = vadd.f32 %v2328_v39, %v2008_v21  ;;  %v2332_v43 = vpop.eup %2331 }
 0x297   :  { %v2334_v45 = vpop.eup %2333 }
 0x298   :  { %v2010_v42 = vadd.f32 %v2330_v41, %v2009_v40  ;;  %v2336_v47 = vpop.eup %2335 }
 0x299   :  { %v2338_v48 = vpop.eup %2337 }
 0x29a   :  { %v2011_v44 = vadd.f32 %v2332_v43, %v2010_v42 }
 0x29c   :  { %v2012_v46 = vadd.f32 %v2334_v45, %v2011_v44 }
 0x29e   :  { %v2013_v12 = vadd.f32 %v2336_v47, %v2012_v46 }
 0x2a0   :  { %v2014_v49 = vadd.f32 %v2338_v48, %v2013_v12 }
 0x2a2   :  { %2015 = vadd.xlane.f32.xlu0 %v2014_v49 }
 0x32f   :  { %v2016_v50 = vpop.xlane.xlu0 %2015 }
 0x330   :  { %2339 = vrcp.f32 %v2016_v50 }
 0x33a   :  { %v2340_v51 = vpop.eup %2339 }
 0x33b   :  { %v2019_v57 = vmul.f32 %v2340_v51, %v2324_v37  ;;  %v2020_v52 = vmul.f32 %v2340_v51, %v2326_v38  ;;  %v2021_v53 = vmul.f32 %v2340_v51, %v2328_v39  ;;  %v2022_v54 = vmul.f32 %v2340_v51, %v2330_v41 }
 0x33c   :  { %v2023_v55 = vmul.f32 %v2340_v51, %v2332_v43  ;;  %v2024_v22 = vmul.f32 %v2340_v51, %v2334_v45  ;;  %v2025_v56 = vmul.f32 %v2340_v51, %v2336_v47  ;;  %v2026_v58 = vmul.f32 %v2340_v51, %v2338_v48 }
 0x33d   :  { %2027 = vst [vmem:[%s2466_s3] sm:$0xff] %v2019_v57  ;;  %2028 = vst [vmem:[%s2466_s3 + $0x8] sm:$0xff] %v2020_v52 }
 0x33e   :  { %2029 = vst [vmem:[%s2466_s3 + $0x10] sm:$0xff] %v2021_v53  ;;  %2030 = vst [vmem:[%s2466_s3 + $0x18] sm:$0xff] %v2022_v54 }
 0x33f   :  { %2031 = vst [vmem:[%s2466_s3 + $0x20] sm:$0xff] %v2023_v55  ;;  %2032 = vst [vmem:[%s2466_s3 + $0x28] sm:$0xff] %v2024_v22 }
 0x340   :  { %2033 = vst [vmem:[%s2466_s3 + $0x30] sm:$0xff] %v2025_v56  ;;  %2034 = vst [vmem:[%s2466_s3 + $0x38] sm:$0xff] %v2026_v58 }
 0x341   :  { %2039 = vsyncpa [#allocation3], 1 }

</bundles_post_ra>
